<compile_context>
chip_gen: v7x
topology: tpu7x:2x2x1
jax: 0.10.0
libtpu: 0.0.40
codegen_flags: <defaults>
</compile_context>

<pallas_src>
import functools

import jax
import jax.numpy as jnp
from jax.experimental import pallas as pl
from jax.experimental.pallas import tpu as pltpu


def _cdiv(a, b):
    return (a + b - 1) // b


def _round_up(a, b):
    return _cdiv(a, b) * b


def _vmem_budget_bytes() -> int:
    """Scoped-VMEM budget derived per chip generation (v7x has only 64 MiB)."""
    try:
        phys = int(pltpu.get_tpu_info().vmem_capacity_bytes)
    except Exception:
        phys = 64 << 20  # assume the smallest (v7x per-TensorCore VMEM)
    return min(phys // 2, 64 << 20)


# ----------------------------- kernels --------------------------------------


def _se_resident_kernel(x_ref, w1_ref, w2_ref, o_ref, *, inv_n, d, fold):
    """Small-N path: whole (folded) x resident, x read from HBM exactly once."""
    x = x_ref[...]                                                   # (M, C)
    s = jnp.sum(x.astype(jnp.float32), axis=0, keepdims=True)        # (1, C)
    s_d = s[:, :d]
    for k in range(1, fold):                                         # undo the row fold
        s_d = s_d + s[:, k * d:(k + 1) * d]
    mean = s_d * inv_n                                               # (1, D)
    # Tiny excitation MLP: Linear -> ReLU -> Linear -> Sigmoid (runs once).
    h = jnp.maximum(jnp.dot(mean, w1_ref[...], preferred_element_type=jnp.float32), 0.0)
    w = jax.nn.sigmoid(jnp.dot(h, w2_ref[...], preferred_element_type=jnp.float32))  # (1, D)
    w_c = jnp.tile(w, (1, fold))                                     # (1, C)
    o_ref[...] = (x * w_c).astype(o_ref.dtype)


def _se_reduce_mlp_kernel(x_ref, w1_ref, w2_ref, o_ref, acc_ref, *,
                          m_valid, inv_n, d, fold, need_mask):
    """Pass 1: accumulate per-tile column sums; finalize with the tiny MLP."""
    i = pl.program_id(0)

    @pl.when(i == 0)
    def _init():
        acc_ref[...] = jnp.zeros_like(acc_ref)

    x = x_ref[...].astype(jnp.float32)                               # (TM, C)
    if need_mask:
        tm = x_ref.shape[0]
        row = jax.lax.broadcasted_iota(jnp.int32, (tm, 1), 0) + i * tm
        x = jnp.where(row < m_valid, x, 0.0)                         # drop padded rows
    acc_ref[...] += jnp.sum(x, axis=0, keepdims=True)                # (1, C) partial sum

    @pl.when(i == pl.num_programs(0) - 1)
    def _finalize():
        s = acc_ref[...]                                             # (1, C)
        s_d = s[:, :d]
        for k in range(1, fold):
            s_d = s_d + s[:, k * d:(k + 1) * d]
        mean = s_d * inv_n                                           # (1, D)
        h = jnp.maximum(jnp.dot(mean, w1_ref[...], preferred_element_type=jnp.float32), 0.0)
        w = jax.nn.sigmoid(jnp.dot(h, w2_ref[...], preferred_element_type=jnp.float32))
        o_ref[...] = jnp.tile(w, (1, fold)).astype(o_ref.dtype)      # (1, C)


def _se_scale_kernel(x_ref, w_ref, o_ref):
    """Pass 2: broadcast-scale one row tile (memory-bound, 'parallel' axis)."""
    o_ref[...] = (x_ref[...] * w_ref[...]).astype(o_ref.dtype)


# ----------------------------- wrapper ---------------------------------------


def se_layer_graph(x, w1_t, w2_t, *, row_tile=2048, force_tiled=False):
    """SELayerGraph forward.

    x:    (N, D) node features.
    w1_t: (D, H) = W1.T  (PyTorch nn.Linear(D, D//reduction, bias=False).weight.T)
    w2_t: (H, D) = W2.T  (PyTorch nn.Linear(D//reduction, D, bias=False).weight.T)
    Returns (N, D), same dtype as x.
    """
    N, D = x.shape
    H = w1_t.shape[1]
    assert w1_t.shape == (D, H) and w2_t.shape == (H, D)

    # ---- lane-dense folding: make the kernel's last dim a multiple of 128 ----
    fold = 1
    if D < 128 and 128 % D == 0 and N % (128 // D) == 0:
        fold = 128 // D
    M, C = N // fold, D * fold
    xf = x.reshape(M, C)                       # free row-major reshape

    itemsize = x.dtype.itemsize
    budget = _vmem_budget_bytes()
    mlp_flops = 2 * (D * H + H * D)
    param_bytes = (D * H + H * D) * 4

    # -------- small path: everything resident, single pass over x ------------
    resident_bytes = 2 * M * C * itemsize + param_bytes + C * 4
    if not force_tiled and resident_bytes <= budget // 2:
        out_f = pl.pallas_call(
            functools.partial(_se_resident_kernel, inv_n=1.0 / N, d=D, fold=fold),
            out_shape=jax.ShapeDtypeStruct((M, C), x.dtype),
            in_specs=[pl.BlockSpec(memory_space=pltpu.MemorySpace.VMEM)] * 3,
            out_specs=pl.BlockSpec(memory_space=pltpu.MemorySpace.VMEM),
            compiler_params=pltpu.CompilerParams(vmem_limit_bytes=budget),
            cost_estimate=pl.CostEstimate(
                flops=2 * N * D + mlp_flops,
                transcendentals=D,
                bytes_accessed=2 * N * D * itemsize + param_bytes),
        )(xf, w1_t, w2_t)
        return out_f.reshape(N, D)

    # ------------- large path: two tiled, pipelined passes over x ------------
    TM = max(8, min(_round_up(M, 8), (row_tile // 8) * 8))
    n_tiles = _cdiv(M, TM)
    need_mask = (M % TM) != 0

    weights = pl.pallas_call(
        functools.partial(_se_reduce_mlp_kernel, m_valid=M, inv_n=1.0 / N,
                          d=D, fold=fold, need_mask=need_mask),
        out_shape=jax.ShapeDtypeStruct((1, C), jnp.float32),
        grid_spec=pltpu.PrefetchScalarGridSpec(
            num_scalar_prefetch=0,
            grid=(n_tiles,),
            in_specs=[
                pl.BlockSpec((TM, C), lambda i: (i, 0)),
                pl.BlockSpec((D, H), lambda i: (0, 0)),
                pl.BlockSpec((H, D), lambda i: (0, 0)),
            ],
            out_specs=pl.BlockSpec((1, C), lambda i: (0, 0)),
            scratch_shapes=[pltpu.VMEM((1, C), jnp.float32)],
        ),
        compiler_params=pltpu.CompilerParams(
            dimension_semantics=("arbitrary",),      # accumulator across row tiles
            vmem_limit_bytes=budget),
        cost_estimate=pl.CostEstimate(
            flops=N * D + mlp_flops,
            transcendentals=D,
            bytes_accessed=N * D * itemsize + param_bytes + C * 4),
    )(xf, w1_t, w2_t)

    out_f = pl.pallas_call(
        _se_scale_kernel,
        out_shape=jax.ShapeDtypeStruct((M, C), x.dtype),
        grid_spec=pltpu.PrefetchScalarGridSpec(
            num_scalar_prefetch=0,
            grid=(n_tiles,),
            in_specs=[
                pl.BlockSpec((TM, C), lambda i: (i, 0)),
                pl.BlockSpec((1, C), lambda i: (0, 0)),
            ],
            out_specs=pl.BlockSpec((TM, C), lambda i: (i, 0)),
        ),
        compiler_params=pltpu.CompilerParams(
            dimension_semantics=("parallel",),       # shards across v7x's 2 TCs
            vmem_limit_bytes=budget),
        cost_estimate=pl.CostEstimate(
            flops=N * D,
            transcendentals=0,
            bytes_accessed=2 * N * D * itemsize + C * 4),
    )(xf, weights)
    return out_f.reshape(N, D)


# ----------------------------- test harness ----------------------------------

if __name__ == "__main__":
    def make_params(key, D, H):
        k1, k2 = jax.random.split(key)
        # PyTorch Linear weight shapes: (out_features, in_features).
        w1 = jax.random.normal(k1, (H, D), jnp.float32) * (1.0 / jnp.sqrt(D))
        w2 = jax.random.normal(k2, (D, H), jnp.float32) * (1.0 / jnp.sqrt(H))
        return w1, w2

    def reference(x, w1, w2):
        mean = jnp.mean(x, axis=0, keepdims=True)
        w = jax.nn.sigmoid(jnp.maximum(mean @ w1.T, 0.0) @ w2.T)
        return x * w

    key = jax.random.PRNGKey(0)
    # (N, D, force_tiled, row_tile): exercises the resident path, the tiled
    # multi-tile path, and the tiled path with a masked partial last tile.
    cases = [(16, 64, False, 2048),
             (48, 64, True, 8),
             (19, 64, True, 8)]
    for (N, D, force_tiled, row_tile) in cases:
        H = max(D // 16, 1)
        key, kx, kw = jax.random.split(key, 3)
        x = jax.random.normal(kx, (N, D), dtype=jnp.float32)
        w1, w2 = make_params(kw, D, H)

        out = se_layer_graph(x, w1.T, w2.T, row_tile=row_tile, force_tiled=force_tiled)
        out = jax.block_until_ready(out)

        ref = reference(x, w1, w2)
        assert out.shape == (N, D)
        assert jnp.allclose(out, ref, atol=1e-5, rtol=1e-5), \
            f"mismatch vs reference (N={N}, D={D}, tiled={force_tiled})"

    print("KERNEL_OK")
</pallas_src>

<mosaic_0001>
module attributes {stable_mosaic.version = 11 : i64} {
  func.func @_se_resident_kernel(%arg0: memref<8x128xf32, #tpu.memory_space<vmem>>, %arg1: memref<64x4xf32, #tpu.memory_space<vmem>>, %arg2: memref<4x64xf32, #tpu.memory_space<vmem>>, %arg3: memref<8x128xf32, #tpu.memory_space<vmem>>) attributes {dimension_semantics = [], scalar_prefetch = 0 : i64, scratch_operands = 0 : i64, tpu.core_type = #tpu.core_type<tc>} {
    %c0 = arith.constant 0 : index
    %c0_0 = arith.constant 0 : index
    %0 = vector.load %arg0[%c0, %c0_0] : memref<8x128xf32, #tpu.memory_space<vmem>>, vector<8x128xf32>
    %cst = arith.constant dense<0.000000e+00> : vector<128xf32>
    %1 = vector.multi_reduction <add>, %0, %cst [0] : vector<8x128xf32> to vector<128xf32>
    %2 = vector.shape_cast %1 : vector<128xf32> to vector<1x128xf32>
    %3 = vector.extract_strided_slice %2 {offsets = [0, 0], sizes = [1, 64], strides = [1, 1]} : vector<1x128xf32> to vector<1x64xf32>
    %4 = vector.extract_strided_slice %2 {offsets = [0, 64], sizes = [1, 64], strides = [1, 1]} : vector<1x128xf32> to vector<1x64xf32>
    %5 = arith.addf %3, %4 : vector<1x64xf32>
    %cst_1 = arith.constant 6.250000e-02 : f32
    %6 = vector.broadcast %cst_1 : f32 to vector<1x64xf32>
    %7 = arith.mulf %5, %6 : vector<1x64xf32>
    %c0_2 = arith.constant 0 : index
    %c0_3 = arith.constant 0 : index
    %8 = vector.load %arg1[%c0_2, %c0_3] : memref<64x4xf32, #tpu.memory_space<vmem>>, vector<64x4xf32>
    %cst_4 = arith.constant dense<0.000000e+00> : vector<1x4xf32>
    %9 = tpu.matmul %7, %8, %cst_4 {dimension_numbers = #tpu.dot_dimension_numbers<[1], [0], [0], [1], [0, 0, 1, 1], [], []>} : vector<1x64xf32>, vector<64x4xf32>, vector<1x4xf32> -> vector<1x4xf32>
    %cst_5 = arith.constant 0.000000e+00 : f32
    %10 = vector.broadcast %cst_5 : f32 to vector<1x4xf32>
    %11 = arith.maximumf %9, %10 : vector<1x4xf32>
    %c0_6 = arith.constant 0 : index
    %c0_7 = arith.constant 0 : index
    %12 = vector.load %arg2[%c0_6, %c0_7] : memref<4x64xf32, #tpu.memory_space<vmem>>, vector<4x64xf32>
    %cst_8 = arith.constant dense<0.000000e+00> : vector<1x64xf32>
    %13 = tpu.matmul %11, %12, %cst_8 {dimension_numbers = #tpu.dot_dimension_numbers<[1], [0], [0], [1], [0, 0, 1, 1], [], []>} : vector<1x4xf32>, vector<4x64xf32>, vector<1x64xf32> -> vector<1x64xf32>
    %14 = arith.negf %13 : vector<1x64xf32>
    %15 = math.exp %14 : vector<1x64xf32>
    %cst_9 = arith.constant 1.000000e+00 : f32
    %16 = vector.broadcast %cst_9 : f32 to vector<1x64xf32>
    %17 = arith.addf %16, %15 : vector<1x64xf32>
    %18 = arith.divf %16, %17 : vector<1x64xf32>
    %19 = tpu.concatenate %18, %18 in 1 : vector<1x64xf32>, vector<1x64xf32> -> vector<1x128xf32>
    %20 = vector.broadcast %19 : vector<1x128xf32> to vector<8x128xf32>
    %21 = arith.mulf %0, %20 : vector<8x128xf32>
    %c0_10 = arith.constant 0 : index
    %c0_11 = arith.constant 0 : index
    %22 = vector.load %arg3[%c0_10, %c0_11] : memref<8x128xf32, #tpu.memory_space<vmem>>, vector<8x128xf32>
    tpu.vector_store %arg3[%c0_10, %c0_11], %21 {strides = array<i32>} : memref<8x128xf32, #tpu.memory_space<vmem>>, vector<8x128xf32>,
    return
  }
}

</mosaic_0001>

<bundles_post_ra>
// kernel: tpu_custom_call.1
= control target key start
LH: loop header
LB: loop body
LE: loop exit
PB: predicated region body
PF: predicated region fallthrough
CT: control target
= control target key end

     0   :  { %v305_v4 = vmov 0.0|0.0   ;;  %vm306_vm0 = vmmov 0   ;;  %v307_v10 = vmov 0.0   ;;  %s379_s0 = inlined_call_operand.vmem [shape: f32[8,128], index: 0, kind: input, shape index: {}]   ;;  %s380_s1 = inlined_call_operand.vmem [shape: f32[64,4], index: 1, kind: input, shape index: {}]   ;;  %s381_s2 = inlined_call_operand.vmem [shape: f32[4,64], index: 2, kind: input, shape index: {}]   ;;  %s382_s3 = inlined_call_operand.hbm [shape: f32[8,128], index: 3, kind: output, shape index: {}]  }
   0x1   :  { %v333_v0 = vld [vmem:[%s379_s0] sm:$0xff]  ;;  %v29_v2 = vld [vmem:[%s380_s1 + $0x8] sm:$0xff]  ;;  %260 = vmatprep.subr.bf16.mxu0 %v305_v4  ;;  %v30_v6 = vld [vmem:[%s380_s1 + $0x10] sm:$0xff]  ;;  %252 = vmatprep.mubr.msk.f32.mxu0 %vm306_vm0, %v307_v10 }
   0x2   :  { %v28_v1 = vld [vmem:[%s380_s1] sm:$0xff]  ;;  %v16_v3 = vrot.slane %v333_v0, 4  ;;  %v31_v7 = vld [vmem:[%s380_s1 + $0x18] sm:$0xff] }
   0x3   :  { %v261_v5 = vpack.c.bf16 %v29_v2, %v28_v1  ;;  %v264_v9 = vpack.c.bf16 %v31_v7, %v30_v6 }
   0x4   :  { %v17_v8 = vadd.f32 %v16_v3, %v333_v0 }
   0x5   :  { %262 = vmatpush3.bf16.msra.mxu0 %v261_v5 }
   0x6   :  { %8 = vsyncpa [#allocation3], 0  ;;  %263 = vmatprep.subr.bf16.mxu0 %v305_v4  ;;  %v32_v11 = vld [vmem:[%s380_s1 + $0x20] sm:$0xff]  ;;  %v33_v12 = vld [vmem:[%s380_s1 + $0x28] sm:$0xff]  ;;  %255 = vmatprep.subr.mxu1 %v307_v10  ;;  %v18_v13 = vrot.slane %v17_v8, 2  ;;  %s308_s29 = smov 64   ;;  %v201_v34 = vlaneseq }
   0x7   :  { %257 = vmatprep.mubr.msk.f32.mxu1 %vm306_vm0, %v307_v10  ;;  %v267_v15 = vpack.c.bf16 %v33_v12, %v32_v11  ;;  %v34_v16 = vld [vmem:[%s380_s1 + $0x30] sm:$0xff]  ;;  %v35_v17 = vld [vmem:[%s380_s1 + $0x38] sm:$0xff]  ;;  %vm36_vm1 = vcmask 523264   ;;  %v111_v24 = vld [vmem:[%s381_s2] sm:$0xf]  ;;  %vm116_vm2 = vcmask 1043456  }
   0x8   :  { %v19_v14 = vadd.f32 %v18_v13, %v17_v8  ;;  %v270_v20 = vpack.c.bf16 %v35_v17, %v34_v16  ;;  %256 = vmatpush3.msk.msra.mxu1 %vm116_vm2, %v111_v24  ;;  %vm112_vm3 = vcmask 31744   ;;  %v202_v35 = vshrl.u32 %v201_v34, 7  ;;  %s309_s1 = smov [#allocation2]  }
   0x9   :  { %265 = vmatpush3.bf16.msra.mxu0 %v264_v9  ;;  %s213_s2 = sshll.u32 %s309_s1, 4  ;;  %s214_s2 = int_to_ptr.vmem [resolvable:$true] %s213_s2 }
   0xa   :  { %266 = vmatprep.subr.bf16.mxu0 %v305_v4  ;;  %v20_v18 = vrot.slane %v19_v14, 1  ;;  %v203_v36 = vsub.s32 0, %v202_v35  ;;  %s281_s5 = scalar_lea.vmem %s214_s2, 128  ;;  %p286_p1 = scmp.lt.s32.totalorder %s214_s2, %s214_s2 }
   0xb   :  { %p282_p0 = scmp.ne.s32.totalorder %s214_s2, %s281_s5  ;;  %p287_p2 = scmp.lt.s32.totalorder %s281_s5, %s281_s5 }
   0xc   :  { %v21_v19 = vadd.f32 %v20_v18, %v19_v14 }
   0xd   :  { %268 = vmatpush3.bf16.msra.mxu0 %v267_v15  ;;  %p288_p3 = por %p287_p2, %p286_p1 }
   0xe   :  { %269 = vmatprep.subr.bf16.mxu0 %v305_v4  ;;  %23 = vrot.lane.b32.xlu0 %v21_v19, %s308_s29 }
   0xf   :  { %p289_p4 = pnand %p288_p3, %p282_p0 }
  0x11   :  { %271 = vmatpush3.bf16.msra.mxu0 %v270_v20 }
  0x80   :  { %v24_v21 = vpop.permute.xlu0 %23 }
  0x81   :  { %v26_v22 = vadd.f32 %v24_v21, %v21_v19 }
  0x83   :  { %v27_v23 = vmul.f32 0.0625, %v26_v22 }
  0x85   :  { %253 = vmatmul.mubr.msk.f32.vlgmr.msra.gmra.mrb[0].mxu0 %vm36_vm1, %v27_v23 }
 0x158   :  { %v106_v25 = vpop.f32.mrb[0].mxu0 }
 0x159   :  { %v110_v26 = vmax.f32 %v106_v25, 0.0  ;;  %v254_v27 = vpop.f32.mrb[1].mxu0 }
 0x15b   :  { %258 = vmatmul.mubr.msk.f32.vlgmr.msra.gmra.mrb[0].mxu1 %vm112_vm3, %v110_v26 }
 0x22e   :  { %v186_v28 = vpop.f32.mrb[0].mxu1 }
 0x22f   :  { %v224_v29 = vmul.f32 -1.442695, %v186_v28  ;;  %v259_v30 = vpop.f32.mrb[1].mxu1 }
 0x231   :  { %277 = vpow2.f32 %v224_v29 }
 0x23b   :  { %v278_v31 = vpop.eup %277 }
 0x23c   :  { %v193_v32 = vadd.f32 1.0, %v278_v31 }
 0x23e   :  { %279 = vrcp.f32 %v193_v32 }
 0x248   :  { %v280_v33 = vpop.eup %279 }
 0x249   :  { %197 = vrot.lane.b32.xlu0 %v280_v33, %s308_s29 }
 0x2bb   :  { %v198_v37 = vpop.permute.xlu0 %197 }
 0x2bc   :  { %v200_v38 = vsel %vm36_vm1, %v280_v33, %v198_v37 }
 0x2bd   :  { %v204_v39 = vrot.slane %v200_v38, %v203_v36 }
 0x2bf   :  { %v205_v40 = vmul.f32 %v204_v39, %v333_v0 }
 0x2c1   :  { %206 = vst [vmem:[#allocation2] sm:$0xff] %v205_v40 }
 0x2c2   :  { %292 = shalt.err (!%p289_p4)
}
 0x2c3   :  { %s293_s8 = scalar_lea.hbm %s382_s3, 128 }
 0x2c4   :  { %p294_p5 = scmp.ne.s32.totalorder %s382_s3, %s293_s8  ;;  %p297_p6 = scmp.lt.u32.totalorder %s293_s8, %s382_s3 }
 0x2c6   :  { %p299_p7 = pnand %p297_p6, %p294_p5 }
 0x2c8   :  { %302 = shalt.err (!%p299_p7)
}
 0x2c9   :  { %216 = dma.vmem_to_hbm [thread:$0]  %s214_s2, 128, %s382_s3, [#allocation3]  }
 0x2ca   :  { %303 = dma.done.wait [#allocation3], 128  }
 0x2cb   :  { %304 = vsyncadd [#allocation3], 4294967168 }
 0x2cc   :  { %220 = vsyncpa [#allocation3], 1 }

</bundles_post_ra>
